<compile_context>
chip_gen: v7x
topology: tpu7x:2x2x1
jax: 0.10.0
libtpu: 0.0.40
codegen_flags: <defaults>
</compile_context>

<pallas_src>
import math
import jax
import jax.numpy as jnp
from jax.experimental import pallas as pl
from jax.experimental.pallas import tpu as pltpu

NUM_GROUPS = 32
EPS = 1e-5
VMEM_LIMIT = 32 * 1024 * 1024


# --------------------------------------------------------------------------- #
# pass 1: per-channel sum / sum-of-squares over spatial tiles
# --------------------------------------------------------------------------- #
def _gn_stats_kernel(x_ref, sum_ref, sq_ref):
    @pl.when(pl.program_id(1) == 0)
    def _():
        sum_ref[...] = jnp.zeros_like(sum_ref)
        sq_ref[...] = jnp.zeros_like(sq_ref)

    x = x_ref[0]                                           # (C, TS) f32
    sum_ref[0] += jnp.sum(x, axis=1, keepdims=True)        # (C, 1)
    sq_ref[0] += jnp.sum(x * x, axis=1, keepdims=True)     # (C, 1)


# --------------------------------------------------------------------------- #
# pass 2: GroupNorm affine + fused QKV projection (channel-major output)
# --------------------------------------------------------------------------- #
def _norm_qkv_kernel(x_ref, a_ref, b_ref, w_ref, bias_ref, qkv_ref):
    # h = (x - mean) * inv_std * gamma + beta, pre-reduced to a per-channel affine
    h = (x_ref[0] * a_ref[0] + b_ref[0]).astype(jnp.bfloat16)           # (C, T1)
    # single fused QKV matmul; 1/sqrt(C) already folded into the q rows of w/bias
    qkv = jnp.dot(w_ref[...], h, preferred_element_type=jnp.float32)    # (3C, T1)
    qkv_ref[0] = (qkv + bias_ref[...]).astype(jnp.bfloat16)


# --------------------------------------------------------------------------- #
# pass 3: flash-style attention over key tiles + output gate x * a
# --------------------------------------------------------------------------- #
def _attn_gate_kernel(x_ref, q_ref, k_ref, v_ref, o_ref,
                      qt_sc, m_sc, l_sc, acc_sc):
    ki = pl.program_id(2)

    @pl.when(ki == 0)
    def _():
        # q arrives channel-major (C, TQ); transpose once per query tile so the
        # per-key-step QK^T is a plain NN matmul.  f32 round-trip keeps the
        # transpose on the well-supported 32-bit XLU path; runs once per (b,qi).
        qt_sc[...] = jnp.transpose(
            q_ref[0].astype(jnp.float32)).astype(jnp.bfloat16)          # (TQ, C)
        m_sc[...] = jnp.full_like(m_sc, -jnp.inf)
        l_sc[...] = jnp.zeros_like(l_sc)
        acc_sc[...] = jnp.zeros_like(acc_sc)

    k = k_ref[0]                                                        # (C, TK)
    v = v_ref[0]                                                        # (C, TK)
    s = jnp.dot(qt_sc[...], k, preferred_element_type=jnp.float32)      # (TQ, TK)

    m_prev = m_sc[...]                                                  # (TQ, 1)
    m_new = jnp.maximum(m_prev, jnp.max(s, axis=-1, keepdims=True))
    alpha = jnp.exp(m_prev - m_new)
    p = jnp.exp(s - m_new)                                              # (TQ, TK)
    l_sc[...] = alpha * l_sc[...] + jnp.sum(p, axis=-1, keepdims=True)
    # acc(TQ, C) += p @ v^T : contract the key axis of both operands (NT form)
    acc_sc[...] = alpha * acc_sc[...] + jax.lax.dot_general(
        p.astype(jnp.bfloat16), v, (((1,), (1,)), ((), ())),
        preferred_element_type=jnp.float32)
    m_sc[...] = m_new

    @pl.when(ki == pl.num_programs(2) - 1)
    def _():
        a = acc_sc[...] * pl.reciprocal(l_sc[...], approx=True)         # (TQ, C)
        # write the gated tile channel-major -> lane-dense (B, C, HW) output,
        # no wrapper-side relayout needed afterwards
        o_ref[0] = (x_ref[0] * jnp.transpose(a)).astype(o_ref.dtype)


def _pick_tile(n, cap):
    """Largest divisor of n that is <= cap and a multiple of 128 (spatial axis
    is the lane axis of every block), falling back to the full extent n."""
    if n <= cap:
        return n
    for t in range(cap - cap % 128, 0, -128):
        if n % t == 0:
            return t
    # TODO(synk): pad HW (with key masking in pass 3) instead of a full-extent
    # fallback for spatial sizes with no multiple-of-128 divisor.
    return n


# --------------------------------------------------------------------------- #
# wrapper
# --------------------------------------------------------------------------- #
def nonlocal_block(x_nchw, gamma, beta, w_qkv, b_qkv, *,
                   q_tile=512, k_tile=256, norm_tile=512, stats_tile=1024):
    """x_nchw: (B, C, H, W) f32; w_qkv: (3C, C); b_qkv: (3C,)."""
    B, C, H, W = x_nchw.shape
    assert C % NUM_GROUPS == 0, "GroupNorm(32, C) requires C % 32 == 0"
    HW = H * W
    G = NUM_GROUPS
    gs = C // G
    scale = 1.0 / math.sqrt(C)

    # channel-major tokens: free reshape, no transpose
    x = x_nchw.reshape(B, C, HW).astype(jnp.float32)

    # ---- pass 1: GroupNorm statistics, tiled over HW --------------------------
    TS = _pick_tile(HW, stats_tile)
    sum_c, sq_c = pl.pallas_call(
        _gn_stats_kernel,
        out_shape=(jax.ShapeDtypeStruct((B, C, 1), jnp.float32),
                   jax.ShapeDtypeStruct((B, C, 1), jnp.float32)),
        grid=(B, HW // TS),
        in_specs=[pl.BlockSpec((1, C, TS), lambda b, t: (b, 0, t))],
        out_specs=(pl.BlockSpec((1, C, 1), lambda b, t: (b, 0, 0)),
                   pl.BlockSpec((1, C, 1), lambda b, t: (b, 0, 0))),
        compiler_params=pltpu.CompilerParams(
            dimension_semantics=("parallel", "arbitrary"),
            vmem_limit_bytes=VMEM_LIMIT),
    )(x)

    # tiny (B, C) group-stat math in the wrapper.  Single-sweep E[x^2]-E[x]^2
    # variance (f32); acceptable at the relaxed bf16 tolerance of this block.
    denom = float(gs * HW)
    gsum = sum_c[:, :, 0].reshape(B, G, gs).sum(axis=2)        # (B, G)
    gsq = sq_c[:, :, 0].reshape(B, G, gs).sum(axis=2)          # (B, G)
    mean = gsum / denom
    var = jnp.maximum(gsq / denom - mean * mean, 0.0)
    inv = jax.lax.rsqrt(var + EPS)                             # (B, G)
    inv_c = jnp.repeat(inv, gs, axis=1)                        # (B, C)
    mean_c = jnp.repeat(mean, gs, axis=1)                      # (B, C)
    gamma_f = gamma.astype(jnp.float32)[None, :]
    beta_f = beta.astype(jnp.float32)[None, :]
    a_norm = (inv_c * gamma_f).reshape(B, C, 1).astype(jnp.float32)
    b_norm = (beta_f - mean_c * inv_c * gamma_f).reshape(B, C, 1).astype(jnp.float32)

    # fused QKV weight (3C, C); fold the 1/sqrt(C) attention scale into q rows
    w = w_qkv.astype(jnp.float32)
    w_fused = jnp.concatenate([w[:C] * scale, w[C:]], axis=0).astype(jnp.bfloat16)
    bfull = b_qkv.astype(jnp.float32)
    bias_fused = jnp.concatenate([bfull[:C] * scale, bfull[C:]],
                                 axis=0).reshape(3 * C, 1)

    # ---- pass 2: GroupNorm affine + fused QKV, tiled over HW ------------------
    T1 = _pick_tile(HW, norm_tile)
    qkv = pl.pallas_call(
        _norm_qkv_kernel,
        out_shape=jax.ShapeDtypeStruct((B, 3 * C, HW), jnp.bfloat16),
        grid=(B, HW // T1),
        in_specs=[
            pl.BlockSpec((1, C, T1), lambda b, t: (b, 0, t)),     # x
            pl.BlockSpec((1, C, 1), lambda b, t: (b, 0, 0)),      # affine scale
            pl.BlockSpec((1, C, 1), lambda b, t: (b, 0, 0)),      # affine shift
            pl.BlockSpec((3 * C, C), lambda b, t: (0, 0)),        # fused weight
            pl.BlockSpec((3 * C, 1), lambda b, t: (0, 0)),        # fused bias
        ],
        out_specs=pl.BlockSpec((1, 3 * C, T1), lambda b, t: (b, 0, t)),
        compiler_params=pltpu.CompilerParams(
            dimension_semantics=("parallel", "parallel"),
            vmem_limit_bytes=VMEM_LIMIT),
    )(x, a_norm, b_norm, w_fused, bias_fused)

    # ---- pass 3: flash attention over key tiles + gate -------------------------
    TQ = _pick_tile(HW, q_tile)
    if B * (HW // TQ) < 2:
        # keep both v7x TensorCores busy at small batch
        TQ = _pick_tile(HW, max(HW // 2, 128))
    TK = _pick_tile(HW, k_tile)

    out = pl.pallas_call(
        _attn_gate_kernel,
        out_shape=jax.ShapeDtypeStruct((B, C, HW), jnp.float32),
        grid=(B, HW // TQ, HW // TK),
        in_specs=[
            pl.BlockSpec((1, C, TQ), lambda b, qi, ki: (b, 0, qi)),   # x (gate)
            pl.BlockSpec((1, C, TQ), lambda b, qi, ki: (b, 0, qi)),   # q rows
            pl.BlockSpec((1, C, TK), lambda b, qi, ki: (b, 1, ki)),   # k rows
            pl.BlockSpec((1, C, TK), lambda b, qi, ki: (b, 2, ki)),   # v rows
        ],
        out_specs=pl.BlockSpec((1, C, TQ), lambda b, qi, ki: (b, 0, qi)),
        scratch_shapes=[
            pltpu.VMEM((TQ, C), jnp.bfloat16),   # q transposed (tokens-major)
            pltpu.VMEM((TQ, 1), jnp.float32),    # running max
            pltpu.VMEM((TQ, 1), jnp.float32),    # running denom
            pltpu.VMEM((TQ, C), jnp.float32),    # output accumulator
        ],
        compiler_params=pltpu.CompilerParams(
            dimension_semantics=("parallel", "parallel", "arbitrary"),
            vmem_limit_bytes=VMEM_LIMIT),
    )(x, qkv, qkv, qkv)

    return out.reshape(B, C, H, W)


# --------------------------------------------------------------------------- #
# pure-JAX reference mirroring the PyTorch forward
# --------------------------------------------------------------------------- #
def nonlocal_block_ref(x, gamma, beta, w_qkv, b_qkv):
    B, C, H, W = x.shape
    G = NUM_GROUPS
    xg = x.reshape(B, G, C // G, H, W)
    mean = xg.mean(axis=(2, 3, 4), keepdims=True)
    var = xg.var(axis=(2, 3, 4), keepdims=True)
    hn = ((xg - mean) / jnp.sqrt(var + EPS)).reshape(B, C, H, W)
    hn = hn * gamma[None, :, None, None] + beta[None, :, None, None]
    qkv = jnp.einsum('oc,bchw->bohw', w_qkv, hn) + b_qkv[None, :, None, None]
    qkv = qkv.reshape(B, 3 * C, H * W)
    q, k, v = jnp.split(qkv, 3, axis=1)
    attn = jnp.einsum('bct,bcs->bts', q, k) * (1.0 / math.sqrt(C))
    attn = jax.nn.softmax(attn, axis=2)
    a = jnp.einsum('bts,bcs->bct', attn, v)
    return x * a.reshape(B, C, H, W)


if __name__ == "__main__":
    B, C, H, W = 2, 64, 8, 8   # channels must be divisible by 32 for GroupNorm(32, C)
    key = jax.random.PRNGKey(0)
    kx, kg, kb, kw, kbias = jax.random.split(key, 5)

    x = jax.random.normal(kx, (B, C, H, W), dtype=jnp.float32)
    gamma = 1.0 + 0.1 * jax.random.normal(kg, (C,), dtype=jnp.float32)
    beta = 0.1 * jax.random.normal(kb, (C,), dtype=jnp.float32)
    w_qkv = jax.random.normal(kw, (3 * C, C), dtype=jnp.float32) / math.sqrt(C)
    b_qkv = 0.05 * jax.random.normal(kbias, (3 * C,), dtype=jnp.float32)

    out = nonlocal_block(x, gamma, beta, w_qkv, b_qkv)
    out = jax.block_until_ready(out)

    ref = nonlocal_block_ref(x, gamma, beta, w_qkv, b_qkv)
    assert out.shape == (B, C, H, W)
    # bf16 MXU operands -> relaxed tolerance vs the f32 reference
    assert jnp.allclose(out, ref, atol=5e-2, rtol=5e-2), (
        "mismatch vs reference; max abs err = %f"
        % float(jnp.max(jnp.abs(out - ref))))

    print("KERNEL_OK")
</pallas_src>

<mosaic_0001>
module attributes {stable_mosaic.version = 11 : i64} {
  func.func @_gn_stats_kernel(%arg0: i32, %arg1: i32, %arg2: memref<1x64x64xf32, #tpu.memory_space<vmem>>, %arg3: memref<1x64x1xf32, #tpu.memory_space<vmem>>, %arg4: memref<1x64x1xf32, #tpu.memory_space<vmem>>) attributes {dimension_semantics = [#tpu.dimension_semantics<parallel>, #tpu.dimension_semantics<arbitrary>], iteration_bounds = array<i64: 2, 1>, scalar_prefetch = 0 : i64, scratch_operands = 0 : i64, tpu.core_type = #tpu.core_type<tc>, window_params = [{transform_indices = @transform_0, window_bounds = array<i64: 1, 64, 64>}, {transform_indices = @transform_1, window_bounds = array<i64: 1, 64, 1>}, {transform_indices = @transform_2, window_bounds = array<i64: 1, 64, 1>}]} {
    %c0_i32 = arith.constant 0 : i32
    %0 = arith.cmpi eq, %arg1, %c0_i32 : i32
    %1 = arith.extui %0 : i1 to i32
    %c0_i32_0 = arith.constant 0 : i32
    %2 = arith.cmpi ne, %1, %c0_i32_0 : i32
    scf.if %2 {
      %cst_16 = arith.constant 0.000000e+00 : f32
      %22 = vector.broadcast %cst_16 : f32 to vector<1x64x1xf32>
      %c0_17 = arith.constant 0 : index
      %c0_18 = arith.constant 0 : index
      %c0_19 = arith.constant 0 : index
      %23 = vector.load %arg3[%c0_17, %c0_18, %c0_19] : memref<1x64x1xf32, #tpu.memory_space<vmem>>, vector<1x64x1xf32>
      tpu.vector_store %arg3[%c0_17, %c0_18, %c0_19], %22 {strides = array<i32>} : memref<1x64x1xf32, #tpu.memory_space<vmem>>, vector<1x64x1xf32>,
      %cst_20 = arith.constant 0.000000e+00 : f32
      %24 = vector.broadcast %cst_20 : f32 to vector<1x64x1xf32>
      %c0_21 = arith.constant 0 : index
      %c0_22 = arith.constant 0 : index
      %c0_23 = arith.constant 0 : index
      %25 = vector.load %arg4[%c0_21, %c0_22, %c0_23] : memref<1x64x1xf32, #tpu.memory_space<vmem>>, vector<1x64x1xf32>
      tpu.vector_store %arg4[%c0_21, %c0_22, %c0_23], %24 {strides = array<i32>} : memref<1x64x1xf32, #tpu.memory_space<vmem>>, vector<1x64x1xf32>,
    } else {
    }
    %c0 = arith.constant 0 : index
    %c0_1 = arith.constant 0 : index
    %c0_2 = arith.constant 0 : index
    %3 = vector.load %arg2[%c0, %c0_1, %c0_2] : memref<1x64x64xf32, #tpu.memory_space<vmem>>, vector<1x64x64xf32>
    %4 = vector.shape_cast %3 : vector<1x64x64xf32> to vector<64x64xf32>
    %c0_3 = arith.constant 0 : index
    %c0_4 = arith.constant 0 : index
    %c0_5 = arith.constant 0 : index
    %5 = vector.load %arg3[%c0_3, %c0_4, %c0_5] : memref<1x64x1xf32, #tpu.memory_space<vmem>>, vector<1x64x1xf32>
    %6 = vector.shape_cast %5 : vector<1x64x1xf32> to vector<64x1xf32>
    %cst = arith.constant dense<0.000000e+00> : vector<64xf32>
    %7 = vector.multi_reduction <add>, %4, %cst [1] : vector<64x64xf32> to vector<64xf32>
    %8 = vector.shape_cast %7 : vector<64xf32> to vector<64x1xf32>
    %9 = arith.addf %6, %8 : vector<64x1xf32>
    %c0_6 = arith.constant 0 : index
    %c0_7 = arith.constant 0 : index
    %c0_8 = arith.constant 0 : index
    %10 = vector.load %arg3[%c0_6, %c0_7, %c0_8] : memref<1x64x1xf32, #tpu.memory_space<vmem>>, vector<1x64x1xf32>
    %11 = vector.shape_cast %10 : vector<1x64x1xf32> to vector<64x1xf32>
    %12 = vector.shape_cast %9 : vector<64x1xf32> to vector<1x64x1xf32>
    tpu.vector_store %arg3[%c0_6, %c0_7, %c0_8], %12 {strides = array<i32>} : memref<1x64x1xf32, #tpu.memory_space<vmem>>, vector<1x64x1xf32>,
    %c0_9 = arith.constant 0 : index
    %c0_10 = arith.constant 0 : index
    %c0_11 = arith.constant 0 : index
    %13 = vector.load %arg4[%c0_9, %c0_10, %c0_11] : memref<1x64x1xf32, #tpu.memory_space<vmem>>, vector<1x64x1xf32>
    %14 = vector.shape_cast %13 : vector<1x64x1xf32> to vector<64x1xf32>
    %15 = arith.mulf %4, %4 : vector<64x64xf32>
    %cst_12 = arith.constant dense<0.000000e+00> : vector<64xf32>
    %16 = vector.multi_reduction <add>, %15, %cst_12 [1] : vector<64x64xf32> to vector<64xf32>
    %17 = vector.shape_cast %16 : vector<64xf32> to vector<64x1xf32>
    %18 = arith.addf %14, %17 : vector<64x1xf32>
    %c0_13 = arith.constant 0 : index
    %c0_14 = arith.constant 0 : index
    %c0_15 = arith.constant 0 : index
    %19 = vector.load %arg4[%c0_13, %c0_14, %c0_15] : memref<1x64x1xf32, #tpu.memory_space<vmem>>, vector<1x64x1xf32>
    %20 = vector.shape_cast %19 : vector<1x64x1xf32> to vector<64x1xf32>
    %21 = vector.shape_cast %18 : vector<64x1xf32> to vector<1x64x1xf32>
    tpu.vector_store %arg4[%c0_13, %c0_14, %c0_15], %21 {strides = array<i32>} : memref<1x64x1xf32, #tpu.memory_space<vmem>>, vector<1x64x1xf32>,
    return
  }
  func.func @transform_0(%arg0: i32, %arg1: i32) -> (i32, i32, i32) {
    %c0_i32 = arith.constant 0 : i32
    %c0_i32_0 = arith.constant 0 : i32
    return %arg0, %c0_i32, %arg1 : i32, i32, i32
  }
  func.func @transform_1(%arg0: i32, %arg1: i32) -> (i32, i32, i32) {
    %c0_i32 = arith.constant 0 : i32
    %c0_i32_0 = arith.constant 0 : i32
    %c0_i32_1 = arith.constant 0 : i32
    return %arg0, %c0_i32, %c0_i32_0 : i32, i32, i32
  }
  func.func @transform_2(%arg0: i32, %arg1: i32) -> (i32, i32, i32) {
    %c0_i32 = arith.constant 0 : i32
    %c0_i32_0 = arith.constant 0 : i32
    %c0_i32_1 = arith.constant 0 : i32
    return %arg0, %c0_i32, %c0_i32_0 : i32, i32, i32
  }
}

</mosaic_0001>

<bundles_post_ra>
// kernel: tpu_custom_call.1
= control target key start
LH: loop header
LB: loop body
LE: loop exit
PB: predicated region body
PF: predicated region fallthrough
CT: control target
= control target key end

     0   :  { %8 = vsyncpa [#allocation3], 0  ;;  %s858_s0 = inlined_call_operand.hbm [shape: f32[2,64,64], index: 0, kind: input, shape index: {}]   ;;  %s859_s1 = inlined_call_operand.vmem [shape: f32[2,64,1], index: 1, kind: output, shape index: {0}]   ;;  %s860_s2 = inlined_call_operand.vmem [shape: f32[2,64,1], index: 2, kind: output, shape index: {1}]  }
   0x1   :  { %10 = vsyncpa [#allocation3 + $0x1], 0  ;;  %s614_s9 = smov 0   ;;  %s616_s10 = smov 0  }
   0x2   :  { %s618_s11 = smov 0   ;;  %s620_s12 = smov 0  }
   0x3   :  { %s622_s13 = smov 0   ;;  %s624_s14 = smov 0  }
   0x4 LB: > { %s437_s15 = sadd.s32 4294967295, %s593_s14   ;;  %s28_s16 = sadd.s32 1, %s589_s13  ;;  %s593_s14 = sphi %s624_s14, %s16_s14   ;;  %s589_s13 = sphi %s622_s13, %s868_s13   ;;  %s585_s12 = sphi %s620_s12, %s867_s12   ;;  %s581_s11 = sphi %s618_s11, %s866_s11   ;;  %s577_s10 = sphi %s616_s10, %s865_s10   ;;  %s573_s9 = sphi %s614_s9, %s864_s9  }
   0x5   : > { %p30_p0 = scmp.ge.s32.totalorder %s28_s16, 2  ;;  %s37_s17 = sadd.s32 1, %s581_s11 }
   0x6   : > { %p44_p1 = scmp.ne.s32.totalorder %s581_s11, %s577_s10  ;;  %p45_p2 = scmp.eq.s32.totalorder %s593_s14, 0 }
   0x7   : > { %s870_s16 = smov (%p30_p0, %s28_s16), 0  ;;  %p50_p4 = scmp.ne.s32.totalorder %s577_s10, %s573_s9 }
   0x8   : > { %p650_p3 = por %p45_p2, %p44_p1  ;;  %s32_s19 = ssub.s32 %s589_s13, %s870_s16 }
   0x9   : > { %p51_p5 = scmp.eq.s32.totalorder %s437_s15, 0  ;;  %p35_p6 = scmp.eq.s32.totalorder %s32_s19, 0 }
   0xa   : > { %p461_p8 = scmp.lt.s32.totalorder %s593_s14, 2  ;;  %s126_s22 = sand.u32 1, %s581_s11  }
   0xb   : > { %p657_p7 = por %p51_p5, %p50_p4  ;;  %s452_s23 = sshll.u32 %s589_s13, 10 }
   0xc   : > { %s663_s21 = scalar_select %p35_p6, %s581_s11, %s37_s17  }
   0xd   : > { %s441_s24 = sshll.u32 %s126_s22, 6  ;;  %s670_s27 = scalar_lea.hbm %s858_s0, %s452_s23 }
   0xe   : > { %s130_s28 = scalar_lea.vmem [#allocation2], %s441_s24  ;;  %p674_p9 = pnand %p461_p8, %p650_p3 }
   0xf   : > { %s138_s29 = sshll.u32 %s130_s28, 4  ;;  %s680_s3 = scalar_lea.sflag [#allocation3], %s126_s22  ;;  %s678_s29 = int_to_ptr.vmem [resolvable:$true] %s138_s29 }
  0x10   : > { %s513_s4 = scalar_lea.hbm %s670_s27, 1024  ;;  %p515_p11 = pneg %p674_p9 }
  0x11   : > { %p514_p10 = scmp.ne.s32.totalorder %s670_s27, %s513_s4  ;;  %s518_s7 = scalar_lea.hbm %s858_s0, 2048 }
  0x12   : > { %p519_p0 = scmp.lt.u32.totalorder %s670_s27, %s858_s0  ;;  %p520_p1 = scmp.lt.u32.totalorder %s518_s7, %s513_s4 }
  0x13   : > { %p516_p12 = pnand %p515_p11, %p514_p10  ;;  %p522_p3 = scmp.lt.u32.totalorder %s513_s4, %s670_s27 }
  0x14   : > { %p521_p2 = por %p520_p1, %p519_p0 }
  0x15   : > { %p517_p13 = pneg %p516_p12 }
  0x16   : > { %p523_p4 = por %p522_p3, %p521_p2 }
  0x18   : > { %p524_p5 = pnand %p523_p4, %p517_p13 }
  0x1a   : > { %527 = shalt.err (!%p524_p5)
}
  0x1b   : > { %s528_s15 = scalar_lea.vmem %s678_s29, 1024  ;;  %s595_s17 = smov [#allocation2]  }
  0x1c   : > { %p529_p6 = scmp.ne.s32.totalorder %s678_s29, %s528_s15  ;;  %s533_s18 = sshll.u32 %s595_s17, 4  ;;  %s534_s18 = int_to_ptr.vmem [resolvable:$false] %s533_s18 }
  0x1d   : > { %s535_s19 = scalar_lea.vmem %s534_s18, 2048  ;;  %p536_p12 = scmp.lt.s32.totalorder %s678_s29, %s534_s18 }
  0x1e   : > { %p531_p8 = pnand %p529_p6, %p515_p11  ;;  %p537_p0 = scmp.lt.s32.totalorder %s535_s19, %s528_s15 }
  0x20   : > { %p532_p10 = pneg %p531_p8  ;;  %p538_p1 = por %p537_p0, %p536_p12 }
  0x22   : > { %p539_p2 = pnand %p538_p1, %p532_p10 }
  0x24   : > { %542 = shalt.err (!%p539_p2)
}
  0x25   : > { %s596_s22 = smov 128   ;;  %s597_s23 = smov 8  }
  0x26   : > { %460 = dma.hbm_to_vmem [thread:$0]  (!%p674_p9), %s670_s27, 1024, %s678_s29, %s680_s3, %s596_s22, %s596_s22, %s597_s23  }
  0x27   : > { %p444_p11 = scmp.ge.s32.totalorder %s593_s14, 1  ;;  %p146_p13 = scmp.lt.s32.totalorder %s593_s14, 3 }
  0x29   : > { %p147_p3 = pnand %p444_p11, %p146_p13 }
  0x2a   : > { %s152_s24 = sand.u32 (!%p147_p3), 1, %s577_s10  }
  0x2b   : > { %150 = sbr.rel (%p147_p3) target bundleno = 227 (0xe3), region = 24  ;;  %s445_s25 = sshll.u32 (!%p147_p3), %s152_s24, 6 }
  0x2c   : > { %s153_s26 = scalar_lea.sflag (!%p147_p3), [#allocation3], %s152_s24  ;;  %s711_s28 = scalar_lea.vmem (!%p147_p3), [#allocation2], %s445_s25 }
  0x32   : > { %568 = dma.done.wait (%p657_p7), %s153_s26, 1024  }
  0x33   : > { %570 = vsyncadd (%p657_p7), %s153_s26, 4294966272  ;;  %p182_p9 = scmp.lt.s32.totalorder %s585_s12, 1  ;;  %vm196_vm0 = vcmask 7168   ;;  %vm229_vm1 = vcmask 523264   ;;  %v598_v0 = vmov 0.0   ;;  %v215_v1 = vld [vmem:[%s711_s28 + $0x10] sm:$0xff] }
  0x34   : > { %v213_v2 = vld [vmem:[%s711_s28] sm:$0xff]  ;;  %v216_v3 = vld [vmem:[%s711_s28 + $0x18] sm:$0xff]  ;;  %v236_v4 = vsel %vm229_vm1, %v215_v1, 0.0  ;;  %v214_v6 = vld [vmem:[%s711_s28 + $0x8] sm:$0xff]  ;;  %v281_v19 = vmul.f32 %v215_v1, %v215_v1 }
  0x35   : > { %s872_s12 = smov (!%p182_p9, %s585_s12), 1  ;;  %v230_v5 = vsel %vm229_vm1, %v213_v2, 0.0  ;;  %237 = vadd.xlane.f32.xlu1 %v236_v4  ;;  %v239_v7 = vsel %vm229_vm1, %v216_v3, 0.0  ;;  %v233_v8 = vsel %vm229_vm1, %v214_v6, 0.0  ;;  %v218_v9 = vld [vmem:[%s711_s28 + $0x28] sm:$0xff]  ;;  %v217_v10 = vld [vmem:[%s711_s28 + $0x20] sm:$0xff]  ;;  %v279_v15 = vmul.f32 %v213_v2, %v213_v2 }
  0x36   : > { %s453_s27 = sshll.u32 %s872_s12, 6  ;;  %231 = vadd.xlane.f32.xlu0 %v230_v5  ;;  %v245_v11 = vsel %vm229_vm1, %v218_v9, 0.0  ;;  %v242_v12 = vsel %vm229_vm1, %v217_v10, 0.0  ;;  %v220_v13 = vld [vmem:[%s711_s28 + $0x38] sm:$0xff]  ;;  %v219_v14 = vld [vmem:[%s711_s28 + $0x30] sm:$0xff]  ;;  %v280_v18 = vmul.f32 %v214_v6, %v214_v6  ;;  %v282_v22 = vmul.f32 %v216_v3, %v216_v3 }
  0x37   : > { %s727_s20 = scalar_lea.vmem %s859_s1, %s453_s27  ;;  %v251_v16 = vsel %vm229_vm1, %v220_v13, 0.0  ;;  %v248_v17 = vsel %vm229_vm1, %v219_v14, 0.0  ;;  %v287_v21 = vsel %vm229_vm1, %v279_v15, 0.0  ;;  %v293_v24 = vsel %vm229_vm1, %v281_v19, 0.0  ;;  %s772_s5 = scalar_lea.vmem %s860_s2, %s453_s27 }
  0x38   : > { %199 = vst.msk [vmem:[%s727_s20 + $0x10] sm:$0xff] %vm196_vm0, %v598_v0  ;;  %197 = vst.msk [vmem:[%s727_s20] sm:$0xff] %vm196_vm0, %v598_v0  ;;  %v290_v20 = vsel %vm229_vm1, %v280_v18, 0.0  ;;  %v296_v23 = vsel %vm229_vm1, %v282_v22, 0.0  ;;  %v284_v25 = vmul.f32 %v218_v9, %v218_v9  ;;  %v283_v26 = vmul.f32 %v217_v10, %v217_v10 }
  0x39   : > { %198 = vst.msk [vmem:[%s727_s20 + $0x8] sm:$0xff] %vm196_vm0, %v598_v0  ;;  %200 = vst.msk [vmem:[%s727_s20 + $0x18] sm:$0xff] %vm196_vm0, %v598_v0  ;;  %240 = vadd.xlane.f32.xlu1 %v239_v7  ;;  %v286_v29 = vmul.f32 %v220_v13, %v220_v13  ;;  %v285_v30 = vmul.f32 %v219_v14, %v219_v14 }
  0x3a   : > { %201 = vst.msk [vmem:[%s727_s20 + $0x20] sm:$0xff] %vm196_vm0, %v598_v0  ;;  %202 = vst.msk [vmem:[%s727_s20 + $0x28] sm:$0xff] %vm196_vm0, %v598_v0  ;;  %234 = vadd.xlane.f32.xlu0 %v233_v8  ;;  %v302_v27 = vsel %vm229_vm1, %v284_v25, 0.0  ;;  %v299_v28 = vsel %vm229_vm1, %v283_v26, 0.0 }
  0x3b   : > { %203 = vst.msk [vmem:[%s727_s20 + $0x30] sm:$0xff] %vm196_vm0, %v598_v0  ;;  %204 = vst.msk [vmem:[%s727_s20 + $0x38] sm:$0xff] %vm196_vm0, %v598_v0  ;;  %v308_v31 = vsel %vm229_vm1, %v286_v29, 0.0  ;;  %v305_v32 = vsel %vm229_vm1, %v285_v30, 0.0 }
  0x3c   : > { %206 = vst.msk [vmem:[%s772_s5 + $0x8] sm:$0xff] %vm196_vm0, %v598_v0  ;;  %205 = vst.msk [vmem:[%s772_s5] sm:$0xff] %vm196_vm0, %v598_v0 }
  0x3d   : > { %246 = vadd.xlane.f32.xlu1 %v245_v11  ;;  %207 = vst.msk [vmem:[%s772_s5 + $0x10] sm:$0xff] %vm196_vm0, %v598_v0  ;;  %208 = vst.msk [vmem:[%s772_s5 + $0x18] sm:$0xff] %vm196_vm0, %v598_v0 }
  0x3e   : > { %243 = vadd.xlane.f32.xlu0 %v242_v12  ;;  %209 = vst.msk [vmem:[%s772_s5 + $0x20] sm:$0xff] %vm196_vm0, %v598_v0  ;;  %210 = vst.msk [vmem:[%s772_s5 + $0x28] sm:$0xff] %vm196_vm0, %v598_v0 }
  0x3f   : > { %211 = vst.msk [vmem:[%s772_s5 + $0x30] sm:$0xff] %vm196_vm0, %v598_v0  ;;  %212 = vst.msk [vmem:[%s772_s5 + $0x38] sm:$0xff] %vm196_vm0, %v598_v0  ;;  %v223_v33 = vld [vmem:[%s727_s20 + $0x10] sm:$0xff]  ;;  %v221_v34 = vld [vmem:[%s727_s20] sm:$0xff] }
  0x40   : > { %v224_v39 = vld [vmem:[%s727_s20 + $0x18] sm:$0xff]  ;;  %v222_v40 = vld [vmem:[%s727_s20 + $0x8] sm:$0xff] }
  0x41   : > { %252 = vadd.xlane.f32.xlu1 %v251_v16  ;;  %v226_v45 = vld [vmem:[%s727_s20 + $0x28] sm:$0xff]  ;;  %v225_v46 = vld [vmem:[%s727_s20 + $0x20] sm:$0xff] }
  0x42   : > { %249 = vadd.xlane.f32.xlu0 %v248_v17  ;;  %v228_v51 = vld [vmem:[%s727_s20 + $0x38] sm:$0xff]  ;;  %v227_v52 = vld [vmem:[%s727_s20 + $0x30] sm:$0xff] }
  0x43   : > { %v272_v57 = vld [vmem:[%s772_s5 + $0x8] sm:$0xff]  ;;  %v271_v58 = vld [vmem:[%s772_s5] sm:$0xff] }
  0x44   : > { %v274_v63 = vld [vmem:[%s772_s5 + $0x18] sm:$0xff]  ;;  %v273_v0 = vld [vmem:[%s772_s5 + $0x10] sm:$0xff] }
  0x45   : > { %291 = vadd.xlane.f32.xlu1 %v290_v20  ;;  %v276_v5 = vld [vmem:[%s772_s5 + $0x28] sm:$0xff]  ;;  %v275_v6 = vld [vmem:[%s772_s5 + $0x20] sm:$0xff] }
  0x46   : > { %288 = vadd.xlane.f32.xlu0 %v287_v21  ;;  %v278_v11 = vld [vmem:[%s772_s5 + $0x38] sm:$0xff]  ;;  %v277_v12 = vld [vmem:[%s772_s5 + $0x30] sm:$0xff] }
  0x49   : > { %297 = vadd.xlane.f32.xlu1 %v296_v23 }
  0x4a   : > { %294 = vadd.xlane.f32.xlu0 %v293_v24 }
  0x4d   : > { %303 = vadd.xlane.f32.xlu1 %v302_v27 }
  0x4e   : > { %300 = vadd.xlane.f32.xlu0 %v299_v28 }
  0x51   : > { %309 = vadd.xlane.f32.xlu1 %v308_v31 }
  0x52   : > { %306 = vadd.xlane.f32.xlu0 %v305_v32 }
  0xc2   : > { %v238_v35 = vpop.xlane.xlu1 %237 }
  0xc3   : > { %v232_v36 = vpop.xlane.xlu0 %231  ;;  %v256_v37 = vadd.f32 %v238_v35, %v223_v33 }
  0xc4   : > { %v254_v38 = vadd.f32 %v232_v36, %v221_v34 }
  0xc5   : > { %265 = vst.msk [vmem:[%s727_s20 + $0x10] sm:$0xff] %vm196_vm0, %v256_v37 }
  0xc6   : > { %263 = vst.msk [vmem:[%s727_s20] sm:$0xff] %vm196_vm0, %v254_v38  ;;  %v241_v41 = vpop.xlane.xlu1 %240 }
  0xc7   : > { %v235_v42 = vpop.xlane.xlu0 %234  ;;  %v257_v43 = vadd.f32 %v241_v41, %v224_v39 }
  0xc8   : > { %v255_v44 = vadd.f32 %v235_v42, %v222_v40 }
  0xc9   : > { %266 = vst.msk [vmem:[%s727_s20 + $0x18] sm:$0xff] %vm196_vm0, %v257_v43 }
  0xca   : > { %264 = vst.msk [vmem:[%s727_s20 + $0x8] sm:$0xff] %vm196_vm0, %v255_v44  ;;  %v247_v47 = vpop.xlane.xlu1 %246 }
  0xcb   : > { %v244_v48 = vpop.xlane.xlu0 %243  ;;  %v259_v49 = vadd.f32 %v247_v47, %v226_v45 }
  0xcc   : > { %v258_v50 = vadd.f32 %v244_v48, %v225_v46 }
  0xcd   : > { %268 = vst.msk [vmem:[%s727_s20 + $0x28] sm:$0xff] %vm196_vm0, %v259_v49 }
  0xce   : > { %267 = vst.msk [vmem:[%s727_s20 + $0x20] sm:$0xff] %vm196_vm0, %v258_v50  ;;  %v253_v53 = vpop.xlane.xlu1 %252 }
  0xcf   : > { %v250_v54 = vpop.xlane.xlu0 %249  ;;  %v261_v55 = vadd.f32 %v253_v53, %v228_v51 }
  0xd0   : > { %v260_v56 = vadd.f32 %v250_v54, %v227_v52 }
  0xd1   : > { %270 = vst.msk [vmem:[%s727_s20 + $0x38] sm:$0xff] %vm196_vm0, %v261_v55 }
  0xd2   : > { %269 = vst.msk [vmem:[%s727_s20 + $0x30] sm:$0xff] %vm196_vm0, %v260_v56  ;;  %v292_v59 = vpop.xlane.xlu1 %291 }
  0xd3   : > { %v289_v60 = vpop.xlane.xlu0 %288  ;;  %v312_v61 = vadd.f32 %v292_v59, %v272_v57 }
  0xd4   : > { %v311_v62 = vadd.f32 %v289_v60, %v271_v58 }
  0xd5   : > { %320 = vst.msk [vmem:[%s772_s5 + $0x8] sm:$0xff] %vm196_vm0, %v312_v61 }
  0xd6   : > { %319 = vst.msk [vmem:[%s772_s5] sm:$0xff] %vm196_vm0, %v311_v62  ;;  %v298_v1 = vpop.xlane.xlu1 %297 }
  0xd7   : > { %v295_v2 = vpop.xlane.xlu0 %294  ;;  %v314_v3 = vadd.f32 %v298_v1, %v274_v63 }
  0xd8   : > { %v313_v4 = vadd.f32 %v295_v2, %v273_v0 }
  0xd9   : > { %322 = vst.msk [vmem:[%s772_s5 + $0x18] sm:$0xff] %vm196_vm0, %v314_v3 }
  0xda   : > { %321 = vst.msk [vmem:[%s772_s5 + $0x10] sm:$0xff] %vm196_vm0, %v313_v4  ;;  %v304_v7 = vpop.xlane.xlu1 %303 }
  0xdb   : > { %v301_v8 = vpop.xlane.xlu0 %300  ;;  %v316_v9 = vadd.f32 %v304_v7, %v276_v5 }
  0xdc   : > { %v315_v10 = vadd.f32 %v301_v8, %v275_v6 }
  0xdd   : > { %324 = vst.msk [vmem:[%s772_s5 + $0x28] sm:$0xff] %vm196_vm0, %v316_v9 }
  0xde   : > { %323 = vst.msk [vmem:[%s772_s5 + $0x20] sm:$0xff] %vm196_vm0, %v315_v10  ;;  %v310_v13 = vpop.xlane.xlu1 %309 }
  0xdf   : > { %v307_v14 = vpop.xlane.xlu0 %306  ;;  %v318_v15 = vadd.f32 %v310_v13, %v278_v11 }
  0xe0   : > { %v317_v16 = vadd.f32 %v307_v14, %v277_v12 }
  0xe1   : > { %326 = vst.msk [vmem:[%s772_s5 + $0x38] sm:$0xff] %vm196_vm0, %v318_v15 }
  0xe2   : > { %325 = vst.msk [vmem:[%s772_s5 + $0x30] sm:$0xff] %vm196_vm0, %v317_v16 }
  0xe3 PF: > { %s16_s14 = sadd.s32 1, %s593_s14   ;;  %s864_s9 = smov %s577_s10 }
  0xe4   : > { %p13_p7 = scmp.ge.s32.totalorder %s16_s14, 4   ;;  %s865_s10 = smov %s581_s11 }
  0xe5   : > { %s866_s11 = smov %s663_s21  ;;  %s867_s12 = smov %s589_s13 }
  0xe6   : > { %s868_s13 = smov %s870_s16  ;;  %15 = sbr.rel (!%p13_p7) target bundleno = 4 (0x4), region = 80 }
  0xed   :  { %364 = vsyncpa [#allocation3], 1 }
  0xee   :  { %366 = vsyncpa [#allocation3 + $0x1], 1 }

</bundles_post_ra>
